<compile_context>
chip_gen: v5e
topology: v5e:2x2
jax: 0.10.0
libtpu: 0.0.40
codegen_flags: <defaults>
</compile_context>

<pallas_src>
import math

import jax
import jax.numpy as jnp
from jax.experimental import pallas as pl
from jax.experimental.pallas import tpu as pltpu

EPS = 1e-5


def resblock_kernel(x_ref, hmask_ref, w1_ref, w2_ref, m_ref, mt_ref, p_ref, o_ref):
    # Shapes (R = N*H rows, L = W*Cp lanes, L % 128 == 0):
    #   x_ref     (R, L)    f32  lane-dense input slab (row-major NHWC flatten)
    #   hmask_ref (R, 2L)   f32  [:, :L] zero at image-top rows (h==0),
    #                            [:, L:] zero at image-bottom rows (h==H-1)
    #   w1/w2_ref (3L, L)   bf16 conv weights: 3 block-tridiagonal kh blocks
    #                            stacked along K (kw taps + W zero-padding folded in)
    #   m_ref     (L, Cp)   f32  channel-reduction matrix (tile of eye(Cp))
    #   mt_ref    (Cp, L)   f32  channel-broadcast matrix (m_ref transposed)
    #   p_ref     (6, Cp)   f32  rows = [g1, b1, g2, b2, g3, b3]
    #   o_ref     (R, L)    f32  lane-dense output slab (dense unmasked store)
    R, L = x_ref.shape
    Cp = m_ref.shape[1]
    W = L // Cp
    inv_cnt = 1.0 / (R * W)                 # BN samples per channel = N*H*W

    M = m_ref[...]                          # (L, Cp)
    MT = mt_ref[...]                        # (Cp, L)
    hm = hmask_ref[...]
    not_top = hm[:, :L]                     # 0.0 where this row is an image top row
    not_bot = hm[:, L:]                     # 0.0 where this row is an image bottom row
    zrow = jnp.zeros((1, L), jnp.float32)

    def conv3x3(y, w_ref):
        # 3x3 'same' conv as ONE (R, 3L) x (3L, L) bf16 matmul with f32
        # accumulation.  K concatenates the three kh tap rows
        # [y[h-1] | y[h] | y[h+1]]; the kw taps and the W-direction zero
        # padding live inside the block-tridiagonal weight; the H-direction
        # zero padding is the boundary masks (also kills cross-image rows).
        # Conv bias omitted: cancelled exactly by training-mode BN.
        up = not_top * jnp.concatenate([zrow, y[:-1, :]], axis=0)   # row r -> y[r-1]
        dn = not_bot * jnp.concatenate([y[1:, :], zrow], axis=0)    # row r -> y[r+1]
        k = jnp.concatenate([up, y, dn], axis=1).astype(jnp.bfloat16)   # (R, 3L)
        return jnp.dot(k, w_ref[...], preferred_element_type=jnp.float32)

    def bnorm(y, gamma, beta):
        # Training-mode BatchNorm2d, one pass in f32 (biased variance).
        # Channel reduce and channel broadcast are each a single tiny matmul.
        red = jnp.concatenate([jnp.sum(y, axis=0, keepdims=True),
                               jnp.sum(y * y, axis=0, keepdims=True)], axis=0)  # (2, L)
        ch = jnp.dot(red, M, preferred_element_type=jnp.float32)                # (2, Cp)
        mean = ch[0:1] * inv_cnt
        var = ch[1:2] * inv_cnt - mean * mean
        scale = gamma * jax.lax.rsqrt(var + EPS)                                 # (1, Cp)
        shift = beta - mean * scale
        ss = jnp.dot(jnp.concatenate([scale, shift], axis=0), MT,
                     preferred_element_type=jnp.float32)                         # (2, L)
        return y * ss[0:1] + ss[1:2]

    g1 = p_ref[0:1, :]; b1 = p_ref[1:2, :]
    g2 = p_ref[2:3, :]; b2 = p_ref[3:4, :]
    g3 = p_ref[4:5, :]; b3 = p_ref[5:6, :]

    x = x_ref[...]                          # (R, L) f32

    # --- ConvBNormRelu2d #1: conv -> bnorm -> relu ---
    y = conv3x3(x, w1_ref)
    y = bnorm(y, g1, b1)
    y = jnp.maximum(y, 0.0)

    # --- extra BatchNorm2d ---
    y = bnorm(y, g2, b2)

    # --- ConvBNormRelu2d #2: conv -> bnorm (no relu) ---
    y = conv3x3(y, w2_ref)
    y = bnorm(y, g3, b3)

    # --- residual (dense lane-aligned store) ---
    o_ref[...] = x + y


def _padded_channels(C, W):
    """Smallest Cp >= C such that W*Cp is a multiple of 128 (lane-dense slabs)."""
    step = 128 // math.gcd(W, 128)
    return ((C + step - 1) // step) * step


def _banded_conv_weights(w_hwio, W):
    """Fold the 3 kw taps + W-direction zero padding of a 3x3 conv into three
    block-tridiagonal (L, L) blocks stacked along K.
    w_hwio: (3, 3, Cp, Cp) -> (3*W*Cp, W*Cp)."""
    blocks = []
    for kh in range(3):
        wb = None
        for kw in range(3):
            band = jnp.eye(W, k=1 - kw, dtype=jnp.float32)    # w_in = w_out + kw - 1
            term = jnp.kron(band, w_hwio[kh, kw].astype(jnp.float32))
            wb = term if wb is None else wb + term
        blocks.append(wb)
    return jnp.concatenate(blocks, axis=0)


def resblock_pallas_nhwc(x_nhwc, w1, w2, params):
    """NHWC-native entry (preferred: no layout transposes around the kernel).

    x_nhwc: (N, H, W, C) float32
    w1, w2: (3, 3, C, C) HWIO conv weights
    params: (8, C) rows = [b1, gamma1, beta1, gamma2, beta2, b2, gamma3, beta3]
            (conv biases accepted for API parity; cancelled by training-mode BN).
    """
    x = x_nhwc.astype(jnp.float32)
    N, H, W, C = x.shape
    Cp = _padded_channels(C, W)
    R, L = N * H, W * Cp

    if Cp != C:
        x = jnp.pad(x, ((0, 0), (0, 0), (0, 0), (0, Cp - C)))
        w1 = jnp.pad(w1.astype(jnp.float32),
                     ((0, 0), (0, 0), (0, Cp - C), (0, Cp - C)))
        w2 = jnp.pad(w2.astype(jnp.float32),
                     ((0, 0), (0, 0), (0, Cp - C), (0, Cp - C)))

    x2d = x.reshape(R, L)                                        # metadata-only

    # Image top/bottom row masks (the H-direction 'same' zero padding).
    h_idx = jnp.tile(jnp.arange(H), N)
    not_top = jnp.broadcast_to((h_idx != 0).astype(jnp.float32)[:, None], (R, L))
    not_bot = jnp.broadcast_to((h_idx != H - 1).astype(jnp.float32)[:, None], (R, L))
    hmask = jnp.concatenate([not_top, not_bot], axis=1)          # (R, 2L)

    wb1 = _banded_conv_weights(w1, W).astype(jnp.bfloat16)       # (3L, L)
    wb2 = _banded_conv_weights(w2, W).astype(jnp.bfloat16)

    m = jnp.tile(jnp.eye(Cp, dtype=jnp.float32), (W, 1))         # (L, Cp)
    mt = m.T                                                     # (Cp, L)

    def padc(v):
        return jnp.pad(v.astype(jnp.float32), (0, Cp - C))
    p = jnp.stack([padc(params[1]), padc(params[2]), padc(params[3]),
                   padc(params[4]), padc(params[6]), padc(params[7])], axis=0)

    out2d = pl.pallas_call(
        resblock_kernel,
        out_shape=jax.ShapeDtypeStruct((R, L), jnp.float32),
        grid=(1,),
        in_specs=[
            pl.BlockSpec((R, L), lambda i: (0, 0)),
            pl.BlockSpec((R, 2 * L), lambda i: (0, 0)),
            pl.BlockSpec((3 * L, L), lambda i: (0, 0)),
            pl.BlockSpec((3 * L, L), lambda i: (0, 0)),
            pl.BlockSpec((L, Cp), lambda i: (0, 0)),
            pl.BlockSpec((Cp, L), lambda i: (0, 0)),
            pl.BlockSpec((6, Cp), lambda i: (0, 0)),
        ],
        out_specs=pl.BlockSpec((R, L), lambda i: (0, 0)),
        compiler_params=pltpu.CompilerParams(
            dimension_semantics=("arbitrary",),
            vmem_limit_bytes=32 * 1024 * 1024,   # safe on v5e/v6e/v7x; footprint << limit
        ),
    )(x2d, hmask, wb1, wb2, m, mt, p)

    return out2d.reshape(N, H, W, Cp)[..., :C]


def resblock_pallas(x_nchw, w1, w2, params):
    """NCHW parity wrapper matching the PyTorch interface.  Prefer the NHWC
    entry in-model: the two transposes below are full HBM passes."""
    x_nhwc = jnp.transpose(x_nchw, (0, 2, 3, 1))
    out_nhwc = resblock_pallas_nhwc(x_nhwc, w1, w2, params)
    return jnp.transpose(out_nhwc, (0, 3, 1, 2))


def resblock_ref(x_nchw, w1, w2, params):
    """Pure-JAX reference mirroring the PyTorch forward (training-mode BN)."""
    x = jnp.transpose(x_nchw, (0, 2, 3, 1)).astype(jnp.float32)
    b1, g1, be1, g2, be2, b2, g3, be3 = [params[i] for i in range(8)]

    def conv(y, w, b):
        out = jax.lax.conv_general_dilated(
            y, w, window_strides=(1, 1), padding="SAME",
            dimension_numbers=("NHWC", "HWIO", "NHWC"))
        return out + b

    def bn(y, g, b):
        m = jnp.mean(y, axis=(0, 1, 2), keepdims=True)
        v = jnp.mean((y - m) ** 2, axis=(0, 1, 2), keepdims=True)
        return (y - m) * jax.lax.rsqrt(v + EPS) * g + b

    y = conv(x, w1, b1)
    y = bn(y, g1, be1)
    y = jnp.maximum(y, 0.0)
    y = bn(y, g2, be2)
    y = conv(y, w2, b2)
    y = bn(y, g3, be3)
    return jnp.transpose(x + y, (0, 3, 1, 2))


if __name__ == "__main__":
    key = jax.random.PRNGKey(0)
    kx, kw1, kb1, kw2, kb2, kg, kbeta = jax.random.split(key, 7)

    # in_channels == out_channels is required by the residual add.
    N, C, H, W = 2, 4, 16, 16
    x = jax.random.normal(kx, (N, C, H, W), jnp.float32)            # NCHW like PyTorch
    w1 = jax.random.normal(kw1, (3, 3, C, C), jnp.float32) * 0.1    # (kh, kw, Cin, Cout)
    w2 = jax.random.normal(kw2, (3, 3, C, C), jnp.float32) * 0.1
    b1 = jax.random.normal(kb1, (C,), jnp.float32) * 0.1
    b2 = jax.random.normal(kb2, (C,), jnp.float32) * 0.1
    gammas = 1.0 + 0.1 * jax.random.normal(kg, (3, C), jnp.float32)
    betas = 0.1 * jax.random.normal(kbeta, (3, C), jnp.float32)
    # rows: b1, gamma1, beta1, gamma2, beta2, b2, gamma3, beta3
    params = jnp.stack([b1, gammas[0], betas[0], gammas[1], betas[1],
                        b2, gammas[2], betas[2]], axis=0)

    out = resblock_pallas(x, w1, w2, params)
    jax.block_until_ready(out)

    ref = resblock_ref(x, w1, w2, params)
    assert out.shape == (N, C, H, W), out.shape
    max_err = float(jnp.max(jnp.abs(out - ref)))
    # bf16 conv operands (f32 accumulation) bound the error to ~0.5% of the
    # unit activation scale; 2e-2 abs/rel is comfortably above that.
    assert jnp.allclose(out, ref, atol=2e-2, rtol=2e-2), max_err
    print("KERNEL_OK")
</pallas_src>

<mosaic_0001>
module attributes {stable_mosaic.version = 11 : i64} {
  func.func @resblock_kernel(%arg0: i32, %arg1: memref<32x128xf32, #tpu.memory_space<vmem>>, %arg2: memref<32x256xf32, #tpu.memory_space<vmem>>, %arg3: memref<384x128xbf16, #tpu.memory_space<vmem>>, %arg4: memref<384x128xbf16, #tpu.memory_space<vmem>>, %arg5: memref<128x8xf32, #tpu.memory_space<vmem>>, %arg6: memref<8x128xf32, #tpu.memory_space<vmem>>, %arg7: memref<6x8xf32, #tpu.memory_space<vmem>>, %arg8: memref<32x128xf32, #tpu.memory_space<vmem>>) attributes {dimension_semantics = [#tpu.dimension_semantics<arbitrary>], iteration_bounds = array<i64: 1>, scalar_prefetch = 0 : i64, scratch_operands = 0 : i64, tpu.core_type = #tpu.core_type<tc>, window_params = [{pipeline_mode = #tpu.pipeline_mode<synchronous>, transform_indices = @transform_0, window_bounds = array<i64: 32, 128>}, {pipeline_mode = #tpu.pipeline_mode<synchronous>, transform_indices = @transform_1, window_bounds = array<i64: 32, 256>}, {pipeline_mode = #tpu.pipeline_mode<synchronous>, transform_indices = @transform_2, window_bounds = array<i64: 384, 128>}, {pipeline_mode = #tpu.pipeline_mode<synchronous>, transform_indices = @transform_3, window_bounds = array<i64: 384, 128>}, {pipeline_mode = #tpu.pipeline_mode<synchronous>, transform_indices = @transform_4, window_bounds = array<i64: 128, 8>}, {pipeline_mode = #tpu.pipeline_mode<synchronous>, transform_indices = @transform_5, window_bounds = array<i64: 8, 128>}, {pipeline_mode = #tpu.pipeline_mode<synchronous>, transform_indices = @transform_6, window_bounds = array<i64: 6, 8>}, {pipeline_mode = #tpu.pipeline_mode<synchronous>, transform_indices = @transform_7, window_bounds = array<i64: 32, 128>}]} {
    %c0 = arith.constant 0 : index
    %c0_0 = arith.constant 0 : index
    %0 = vector.load %arg5[%c0, %c0_0] : memref<128x8xf32, #tpu.memory_space<vmem>>, vector<128x8xf32>
    %c0_1 = arith.constant 0 : index
    %c0_2 = arith.constant 0 : index
    %1 = vector.load %arg6[%c0_1, %c0_2] : memref<8x128xf32, #tpu.memory_space<vmem>>, vector<8x128xf32>
    %c0_3 = arith.constant 0 : index
    %c0_4 = arith.constant 0 : index
    %2 = vector.load %arg2[%c0_3, %c0_4] : memref<32x256xf32, #tpu.memory_space<vmem>>, vector<32x256xf32>
    %3 = vector.extract_strided_slice %2 {offsets = [0, 0], sizes = [32, 128], strides = [1, 1]} : vector<32x256xf32> to vector<32x128xf32>
    %4 = vector.extract_strided_slice %2 {offsets = [0, 128], sizes = [32, 128], strides = [1, 1]} : vector<32x256xf32> to vector<32x128xf32>
    %cst = arith.constant 0.000000e+00 : f32
    %5 = vector.broadcast %cst : f32 to vector<1x128xf32>
    %c0_5 = arith.constant 0 : index
    %c0_6 = arith.constant 0 : index
    %6 = vector.load %arg7[%c0_5, %c0_6] : memref<6x8xf32, #tpu.memory_space<vmem>>, vector<1x8xf32>
    %c1 = arith.constant 1 : index
    %c0_7 = arith.constant 0 : index
    %7 = vector.load %arg7[%c1, %c0_7] : memref<6x8xf32, #tpu.memory_space<vmem>>, vector<1x8xf32>
    %c2 = arith.constant 2 : index
    %c0_8 = arith.constant 0 : index
    %8 = vector.load %arg7[%c2, %c0_8] : memref<6x8xf32, #tpu.memory_space<vmem>>, vector<1x8xf32>
    %c3 = arith.constant 3 : index
    %c0_9 = arith.constant 0 : index
    %9 = vector.load %arg7[%c3, %c0_9] : memref<6x8xf32, #tpu.memory_space<vmem>>, vector<1x8xf32>
    %c4 = arith.constant 4 : index
    %c0_10 = arith.constant 0 : index
    %10 = vector.load %arg7[%c4, %c0_10] : memref<6x8xf32, #tpu.memory_space<vmem>>, vector<1x8xf32>
    %c5 = arith.constant 5 : index
    %c0_11 = arith.constant 0 : index
    %11 = vector.load %arg7[%c5, %c0_11] : memref<6x8xf32, #tpu.memory_space<vmem>>, vector<1x8xf32>
    %c0_12 = arith.constant 0 : index
    %c0_13 = arith.constant 0 : index
    %12 = vector.load %arg1[%c0_12, %c0_13] : memref<32x128xf32, #tpu.memory_space<vmem>>, vector<32x128xf32>
    %13 = vector.extract_strided_slice %12 {offsets = [0, 0], sizes = [31, 128], strides = [1, 1]} : vector<32x128xf32> to vector<31x128xf32>
    %14 = tpu.concatenate %5, %13 in 0 : vector<1x128xf32>, vector<31x128xf32> -> vector<32x128xf32>
    %15 = arith.mulf %3, %14 : vector<32x128xf32>
    %16 = vector.extract_strided_slice %12 {offsets = [1, 0], sizes = [31, 128], strides = [1, 1]} : vector<32x128xf32> to vector<31x128xf32>
    %17 = tpu.concatenate %16, %5 in 0 : vector<31x128xf32>, vector<1x128xf32> -> vector<32x128xf32>
    %18 = arith.mulf %4, %17 : vector<32x128xf32>
    %19 = tpu.concatenate %15, %12, %18 in 1 : vector<32x128xf32>, vector<32x128xf32>, vector<32x128xf32> -> vector<32x384xf32>
    %20 = arith.truncf %19 : vector<32x384xf32> to vector<32x384xbf16>
    %c0_14 = arith.constant 0 : index
    %c0_15 = arith.constant 0 : index
    %21 = vector.load %arg3[%c0_14, %c0_15] : memref<384x128xbf16, #tpu.memory_space<vmem>>, vector<384x128xbf16>
    %cst_16 = arith.constant dense<0.000000e+00> : vector<32x128xf32>
    %22 = tpu.matmul %20, %21, %cst_16 {dimension_numbers = #tpu.dot_dimension_numbers<[1], [0], [0], [1], [0, 0, 1, 1], [], []>} : vector<32x384xbf16>, vector<384x128xbf16>, vector<32x128xf32> -> vector<32x128xf32>
    %cst_17 = arith.constant dense<0.000000e+00> : vector<128xf32>
    %23 = vector.multi_reduction <add>, %22, %cst_17 [0] : vector<32x128xf32> to vector<128xf32>
    %24 = vector.shape_cast %23 : vector<128xf32> to vector<1x128xf32>
    %25 = arith.mulf %22, %22 : vector<32x128xf32>
    %cst_18 = arith.constant dense<0.000000e+00> : vector<128xf32>
    %26 = vector.multi_reduction <add>, %25, %cst_18 [0] : vector<32x128xf32> to vector<128xf32>
    %27 = vector.shape_cast %26 : vector<128xf32> to vector<1x128xf32>
    %28 = tpu.concatenate %24, %27 in 0 : vector<1x128xf32>, vector<1x128xf32> -> vector<2x128xf32>
    %cst_19 = arith.constant dense<0.000000e+00> : vector<2x8xf32>
    %29 = tpu.matmul %28, %0, %cst_19 {dimension_numbers = #tpu.dot_dimension_numbers<[1], [0], [0], [1], [0, 0, 1, 1], [], []>} : vector<2x128xf32>, vector<128x8xf32>, vector<2x8xf32> -> vector<2x8xf32>
    %30 = vector.extract_strided_slice %29 {offsets = [0, 0], sizes = [1, 8], strides = [1, 1]} : vector<2x8xf32> to vector<1x8xf32>
    %cst_20 = arith.constant 0.001953125 : f32
    %31 = vector.broadcast %cst_20 : f32 to vector<1x8xf32>
    %32 = arith.mulf %30, %31 : vector<1x8xf32>
    %33 = vector.extract_strided_slice %29 {offsets = [1, 0], sizes = [1, 8], strides = [1, 1]} : vector<2x8xf32> to vector<1x8xf32>
    %cst_21 = arith.constant 0.001953125 : f32
    %34 = vector.broadcast %cst_21 : f32 to vector<1x8xf32>
    %35 = arith.mulf %33, %34 : vector<1x8xf32>
    %36 = arith.mulf %32, %32 : vector<1x8xf32>
    %37 = arith.subf %35, %36 : vector<1x8xf32>
    %cst_22 = arith.constant 9.99999974E-6 : f32
    %38 = vector.broadcast %cst_22 : f32 to vector<1x8xf32>
    %39 = arith.addf %37, %38 : vector<1x8xf32>
    %40 = math.rsqrt %39 : vector<1x8xf32>
    %41 = arith.mulf %6, %40 : vector<1x8xf32>
    %42 = arith.mulf %32, %41 : vector<1x8xf32>
    %43 = arith.subf %7, %42 : vector<1x8xf32>
    %44 = tpu.concatenate %41, %43 in 0 : vector<1x8xf32>, vector<1x8xf32> -> vector<2x8xf32>
    %cst_23 = arith.constant dense<0.000000e+00> : vector<2x128xf32>
    %45 = tpu.matmul %44, %1, %cst_23 {dimension_numbers = #tpu.dot_dimension_numbers<[1], [0], [0], [1], [0, 0, 1, 1], [], []>} : vector<2x8xf32>, vector<8x128xf32>, vector<2x128xf32> -> vector<2x128xf32>
    %46 = vector.extract_strided_slice %45 {offsets = [0, 0], sizes = [1, 128], strides = [1, 1]} : vector<2x128xf32> to vector<1x128xf32>
    %47 = vector.broadcast %46 : vector<1x128xf32> to vector<32x128xf32>
    %48 = arith.mulf %22, %47 : vector<32x128xf32>
    %49 = vector.extract_strided_slice %45 {offsets = [1, 0], sizes = [1, 128], strides = [1, 1]} : vector<2x128xf32> to vector<1x128xf32>
    %50 = vector.broadcast %49 : vector<1x128xf32> to vector<32x128xf32>
    %51 = arith.addf %48, %50 : vector<32x128xf32>
    %cst_24 = arith.constant 0.000000e+00 : f32
    %52 = vector.broadcast %cst_24 : f32 to vector<32x128xf32>
    %53 = arith.maximumf %51, %52 : vector<32x128xf32>
    %cst_25 = arith.constant dense<0.000000e+00> : vector<128xf32>
    %54 = vector.multi_reduction <add>, %53, %cst_25 [0] : vector<32x128xf32> to vector<128xf32>
    %55 = vector.shape_cast %54 : vector<128xf32> to vector<1x128xf32>
    %56 = arith.mulf %53, %53 : vector<32x128xf32>
    %cst_26 = arith.constant dense<0.000000e+00> : vector<128xf32>
    %57 = vector.multi_reduction <add>, %56, %cst_26 [0] : vector<32x128xf32> to vector<128xf32>
    %58 = vector.shape_cast %57 : vector<128xf32> to vector<1x128xf32>
    %59 = tpu.concatenate %55, %58 in 0 : vector<1x128xf32>, vector<1x128xf32> -> vector<2x128xf32>
    %cst_27 = arith.constant dense<0.000000e+00> : vector<2x8xf32>
    %60 = tpu.matmul %59, %0, %cst_27 {dimension_numbers = #tpu.dot_dimension_numbers<[1], [0], [0], [1], [0, 0, 1, 1], [], []>} : vector<2x128xf32>, vector<128x8xf32>, vector<2x8xf32> -> vector<2x8xf32>
    %61 = vector.extract_strided_slice %60 {offsets = [0, 0], sizes = [1, 8], strides = [1, 1]} : vector<2x8xf32> to vector<1x8xf32>
    %cst_28 = arith.constant 0.001953125 : f32
    %62 = vector.broadcast %cst_28 : f32 to vector<1x8xf32>
    %63 = arith.mulf %61, %62 : vector<1x8xf32>
    %64 = vector.extract_strided_slice %60 {offsets = [1, 0], sizes = [1, 8], strides = [1, 1]} : vector<2x8xf32> to vector<1x8xf32>
    %cst_29 = arith.constant 0.001953125 : f32
    %65 = vector.broadcast %cst_29 : f32 to vector<1x8xf32>
    %66 = arith.mulf %64, %65 : vector<1x8xf32>
    %67 = arith.mulf %63, %63 : vector<1x8xf32>
    %68 = arith.subf %66, %67 : vector<1x8xf32>
    %cst_30 = arith.constant 9.99999974E-6 : f32
    %69 = vector.broadcast %cst_30 : f32 to vector<1x8xf32>
    %70 = arith.addf %68, %69 : vector<1x8xf32>
    %71 = math.rsqrt %70 : vector<1x8xf32>
    %72 = arith.mulf %8, %71 : vector<1x8xf32>
    %73 = arith.mulf %63, %72 : vector<1x8xf32>
    %74 = arith.subf %9, %73 : vector<1x8xf32>
    %75 = tpu.concatenate %72, %74 in 0 : vector<1x8xf32>, vector<1x8xf32> -> vector<2x8xf32>
    %cst_31 = arith.constant dense<0.000000e+00> : vector<2x128xf32>
    %76 = tpu.matmul %75, %1, %cst_31 {dimension_numbers = #tpu.dot_dimension_numbers<[1], [0], [0], [1], [0, 0, 1, 1], [], []>} : vector<2x8xf32>, vector<8x128xf32>, vector<2x128xf32> -> vector<2x128xf32>
    %77 = vector.extract_strided_slice %76 {offsets = [0, 0], sizes = [1, 128], strides = [1, 1]} : vector<2x128xf32> to vector<1x128xf32>
    %78 = vector.broadcast %77 : vector<1x128xf32> to vector<32x128xf32>
    %79 = arith.mulf %53, %78 : vector<32x128xf32>
    %80 = vector.extract_strided_slice %76 {offsets = [1, 0], sizes = [1, 128], strides = [1, 1]} : vector<2x128xf32> to vector<1x128xf32>
    %81 = vector.broadcast %80 : vector<1x128xf32> to vector<32x128xf32>
    %82 = arith.addf %79, %81 : vector<32x128xf32>
    %83 = vector.extract_strided_slice %82 {offsets = [0, 0], sizes = [31, 128], strides = [1, 1]} : vector<32x128xf32> to vector<31x128xf32>
    %84 = tpu.concatenate %5, %83 in 0 : vector<1x128xf32>, vector<31x128xf32> -> vector<32x128xf32>
    %85 = arith.mulf %3, %84 : vector<32x128xf32>
    %86 = vector.extract_strided_slice %82 {offsets = [1, 0], sizes = [31, 128], strides = [1, 1]} : vector<32x128xf32> to vector<31x128xf32>
    %87 = tpu.concatenate %86, %5 in 0 : vector<31x128xf32>, vector<1x128xf32> -> vector<32x128xf32>
    %88 = arith.mulf %4, %87 : vector<32x128xf32>
    %89 = tpu.concatenate %85, %82, %88 in 1 : vector<32x128xf32>, vector<32x128xf32>, vector<32x128xf32> -> vector<32x384xf32>
    %90 = arith.truncf %89 : vector<32x384xf32> to vector<32x384xbf16>
    %c0_32 = arith.constant 0 : index
    %c0_33 = arith.constant 0 : index
    %91 = vector.load %arg4[%c0_32, %c0_33] : memref<384x128xbf16, #tpu.memory_space<vmem>>, vector<384x128xbf16>
    %cst_34 = arith.constant dense<0.000000e+00> : vector<32x128xf32>
    %92 = tpu.matmul %90, %91, %cst_34 {dimension_numbers = #tpu.dot_dimension_numbers<[1], [0], [0], [1], [0, 0, 1, 1], [], []>} : vector<32x384xbf16>, vector<384x128xbf16>, vector<32x128xf32> -> vector<32x128xf32>
    %cst_35 = arith.constant dense<0.000000e+00> : vector<128xf32>
    %93 = vector.multi_reduction <add>, %92, %cst_35 [0] : vector<32x128xf32> to vector<128xf32>
    %94 = vector.shape_cast %93 : vector<128xf32> to vector<1x128xf32>
    %95 = arith.mulf %92, %92 : vector<32x128xf32>
    %cst_36 = arith.constant dense<0.000000e+00> : vector<128xf32>
    %96 = vector.multi_reduction <add>, %95, %cst_36 [0] : vector<32x128xf32> to vector<128xf32>
    %97 = vector.shape_cast %96 : vector<128xf32> to vector<1x128xf32>
    %98 = tpu.concatenate %94, %97 in 0 : vector<1x128xf32>, vector<1x128xf32> -> vector<2x128xf32>
    %cst_37 = arith.constant dense<0.000000e+00> : vector<2x8xf32>
    %99 = tpu.matmul %98, %0, %cst_37 {dimension_numbers = #tpu.dot_dimension_numbers<[1], [0], [0], [1], [0, 0, 1, 1], [], []>} : vector<2x128xf32>, vector<128x8xf32>, vector<2x8xf32> -> vector<2x8xf32>
    %100 = vector.extract_strided_slice %99 {offsets = [0, 0], sizes = [1, 8], strides = [1, 1]} : vector<2x8xf32> to vector<1x8xf32>
    %cst_38 = arith.constant 0.001953125 : f32
    %101 = vector.broadcast %cst_38 : f32 to vector<1x8xf32>
    %102 = arith.mulf %100, %101 : vector<1x8xf32>
    %103 = vector.extract_strided_slice %99 {offsets = [1, 0], sizes = [1, 8], strides = [1, 1]} : vector<2x8xf32> to vector<1x8xf32>
    %cst_39 = arith.constant 0.001953125 : f32
    %104 = vector.broadcast %cst_39 : f32 to vector<1x8xf32>
    %105 = arith.mulf %103, %104 : vector<1x8xf32>
    %106 = arith.mulf %102, %102 : vector<1x8xf32>
    %107 = arith.subf %105, %106 : vector<1x8xf32>
    %cst_40 = arith.constant 9.99999974E-6 : f32
    %108 = vector.broadcast %cst_40 : f32 to vector<1x8xf32>
    %109 = arith.addf %107, %108 : vector<1x8xf32>
    %110 = math.rsqrt %109 : vector<1x8xf32>
    %111 = arith.mulf %10, %110 : vector<1x8xf32>
    %112 = arith.mulf %102, %111 : vector<1x8xf32>
    %113 = arith.subf %11, %112 : vector<1x8xf32>
    %114 = tpu.concatenate %111, %113 in 0 : vector<1x8xf32>, vector<1x8xf32> -> vector<2x8xf32>
    %cst_41 = arith.constant dense<0.000000e+00> : vector<2x128xf32>
    %115 = tpu.matmul %114, %1, %cst_41 {dimension_numbers = #tpu.dot_dimension_numbers<[1], [0], [0], [1], [0, 0, 1, 1], [], []>} : vector<2x8xf32>, vector<8x128xf32>, vector<2x128xf32> -> vector<2x128xf32>
    %116 = vector.extract_strided_slice %115 {offsets = [0, 0], sizes = [1, 128], strides = [1, 1]} : vector<2x128xf32> to vector<1x128xf32>
    %117 = vector.broadcast %116 : vector<1x128xf32> to vector<32x128xf32>
    %118 = arith.mulf %92, %117 : vector<32x128xf32>
    %119 = vector.extract_strided_slice %115 {offsets = [1, 0], sizes = [1, 128], strides = [1, 1]} : vector<2x128xf32> to vector<1x128xf32>
    %120 = vector.broadcast %119 : vector<1x128xf32> to vector<32x128xf32>
    %121 = arith.addf %118, %120 : vector<32x128xf32>
    %122 = arith.addf %12, %121 : vector<32x128xf32>
    %c0_42 = arith.constant 0 : index
    %c0_43 = arith.constant 0 : index
    %123 = vector.load %arg8[%c0_42, %c0_43] : memref<32x128xf32, #tpu.memory_space<vmem>>, vector<32x128xf32>
    tpu.vector_store %arg8[%c0_42, %c0_43], %122 {strides = array<i32>} : memref<32x128xf32, #tpu.memory_space<vmem>>, vector<32x128xf32>,
    return
  }
  func.func @transform_0(%arg0: i32) -> (i32, i32) {
    %c0_i32 = arith.constant 0 : i32
    %c0_i32_0 = arith.constant 0 : i32
    %c0_i32_1 = arith.constant 0 : i32
    return %c0_i32, %c0_i32_0 : i32, i32
  }
  func.func @transform_1(%arg0: i32) -> (i32, i32) {
    %c0_i32 = arith.constant 0 : i32
    %c0_i32_0 = arith.constant 0 : i32
    %c0_i32_1 = arith.constant 0 : i32
    return %c0_i32, %c0_i32_0 : i32, i32
  }
  func.func @transform_2(%arg0: i32) -> (i32, i32) {
    %c0_i32 = arith.constant 0 : i32
    %c0_i32_0 = arith.constant 0 : i32
    %c0_i32_1 = arith.constant 0 : i32
    return %c0_i32, %c0_i32_0 : i32, i32
  }
  func.func @transform_3(%arg0: i32) -> (i32, i32) {
    %c0_i32 = arith.constant 0 : i32
    %c0_i32_0 = arith.constant 0 : i32
    %c0_i32_1 = arith.constant 0 : i32
    return %c0_i32, %c0_i32_0 : i32, i32
  }
  func.func @transform_4(%arg0: i32) -> (i32, i32) {
    %c0_i32 = arith.constant 0 : i32
    %c0_i32_0 = arith.constant 0 : i32
    %c0_i32_1 = arith.constant 0 : i32
    return %c0_i32, %c0_i32_0 : i32, i32
  }
  func.func @transform_5(%arg0: i32) -> (i32, i32) {
    %c0_i32 = arith.constant 0 : i32
    %c0_i32_0 = arith.constant 0 : i32
    %c0_i32_1 = arith.constant 0 : i32
    return %c0_i32, %c0_i32_0 : i32, i32
  }
  func.func @transform_6(%arg0: i32) -> (i32, i32) {
    %c0_i32 = arith.constant 0 : i32
    %c0_i32_0 = arith.constant 0 : i32
    %c0_i32_1 = arith.constant 0 : i32
    return %c0_i32, %c0_i32_0 : i32, i32
  }
  func.func @transform_7(%arg0: i32) -> (i32, i32) {
    %c0_i32 = arith.constant 0 : i32
    %c0_i32_0 = arith.constant 0 : i32
    %c0_i32_1 = arith.constant 0 : i32
    return %c0_i32, %c0_i32_0 : i32, i32
  }
}

</mosaic_0001>

<bundles_post_ra>
// kernel: tpu_custom_call.1
= control target key start
LH: loop header
LB: loop body
LE: loop exit
PB: predicated region body
PF: predicated region fallthrough
CT: control target
= control target key end

     0   :  { %12 = vsyncpa [#allocation3], 0  ;;  %s1655_s0 = inlined_call_operand.vmem [shape: f32[32,128], index: 0, kind: input, shape index: {}]   ;;  %s1656_s1 = inlined_call_operand.vmem [shape: f32[32,256], index: 1, kind: input, shape index: {}]   ;;  %s1657_s2 = inlined_call_operand.hbm [shape: bf16[384,128], index: 2, kind: input, shape index: {}]   ;;  %s1658_s3 = inlined_call_operand.hbm [shape: bf16[384,128], index: 3, kind: input, shape index: {}]   ;;  %s1659_s4 = inlined_call_operand.vmem [shape: f32[128,8], index: 4, kind: input, shape index: {}]   ;;  %s1660_s5 = inlined_call_operand.vmem [shape: f32[8,128], index: 5, kind: input, shape index: {}]   ;;  %s1661_s6 = inlined_call_operand.vmem [shape: f32[6,8], index: 6, kind: input, shape index: {}]   ;;  %s1662_s7 = inlined_call_operand.hbm [shape: f32[32,128], index: 7, kind: output, shape index: {}]  }
   0x1   :  { %13 = vsyncpa [#allocation6], 0 }
   0x2   :  { %14 = vsyncpa [#allocation4], 0  ;;  %s23_s26 = sshll.u32 %s1657_s2, 4  ;;  %s1354_s27 = smov [#allocation2]   ;;  %s24_s26 = int_to_ptr.hbm [resolvable:$true] %s23_s26 }
   0x3   :  { %s25_s28 = sshll.u32 %s1354_s27, 4  ;;  %s36_s8 = sshll.u32 %s1658_s3, 4  ;;  %s26_s28 = int_to_ptr.vmem [resolvable:$true] %s25_s28  ;;  %s37_s8 = int_to_ptr.hbm [resolvable:$true] %s36_s8 }
   0x4   :  { %s1355_s9 = smov 64   ;;  %s1356_s10 = smov 4  }
   0x5   :  { %31 = dma.hbm_to_vmem [thread:$0]  %s24_s26, 3072, %s26_s28, [#allocation3], %s1355_s9, %s1355_s9, %s1356_s10  }
   0x6   :  { %s1357_s11 = smov [#allocation5]  }
   0x7   :  { %s38_s12 = sshll.u32 %s1357_s11, 4  ;;  %s39_s12 = int_to_ptr.vmem [resolvable:$true] %s38_s12 }
   0x8   :  { %44 = dma.hbm_to_vmem [thread:$0]  %s37_s8, 3072, %s39_s12, [#allocation6], %s1355_s9, %s1355_s9, %s1356_s10  }
   0x9   :  { %1348 = dma.done.wait [#allocation3], 3072  }
   0xa   :  { %1349 = vsyncadd [#allocation3], 4294964224 }
   0xb   :  { %1350 = dma.done.wait [#allocation6], 3072  }
   0xc   :  { %1351 = vsyncadd [#allocation6], 4294964224  ;;  %v1222_v0 = vld [vmem:[#allocation2 + $0x38] sm:$0xff]  ;;  %v1221_v3 = vld [vmem:[#allocation2 + $0x30] sm:$0xff]  ;;  %vm98_vm0 = vcmask 1040384   ;;  %vm115_vm1 = vcmask 1046528  }
   0xd   :  { %v1230_v1 = vld [vmem:[#allocation2 + $0x78] sm:$0xff]  ;;  %330 = vmatpush.bf16.msra.mxu0 %v1222_v0  ;;  %v1229_v4 = vld [vmem:[#allocation2 + $0x70] sm:$0xff]  ;;  %v1220_v6 = vld [vmem:[#allocation2 + $0x28] sm:$0xff]  ;;  %vm457_vm5 = vcmask 64512   ;;  %s1006_s28 = sshll.u32 %s1662_s7, 4  ;;  %s1359_s29 = smov 128   ;;  %s1007_s28 = int_to_ptr.hbm [resolvable:$true] %s1006_s28 }
   0xe   :  { %v1238_v2 = vld [vmem:[#allocation2 + $0xb8] sm:$0xff]  ;;  %349 = vmatpush.bf16.msra.mxu1 %v1230_v1  ;;  %v1237_v5 = vld [vmem:[#allocation2 + $0xb0] sm:$0xff]  ;;  %v1228_v7 = vld [vmem:[#allocation2 + $0x68] sm:$0xff]  ;;  %s1360_s30 = smov 8  }
   0xf   :  { %368 = vmatpush.bf16.msra.mxu2 %v1238_v2  ;;  %v1236_v8 = vld [vmem:[#allocation2 + $0xa8] sm:$0xff]  ;;  %v1219_v9 = vld [vmem:[#allocation2 + $0x20] sm:$0xff]  ;;  %v1218_v12 = vld [vmem:[#allocation2 + $0x18] sm:$0xff] }
  0x10   :  { %v1227_v10 = vld [vmem:[#allocation2 + $0x60] sm:$0xff]  ;;  %v1226_v13 = vld [vmem:[#allocation2 + $0x58] sm:$0xff]  ;;  %v1415_v16 = vld [vmem:[%s1655_s0 + $0x8] sm:$0xff] }
  0x11   :  { %331 = vmatpush.bf16.msra.mxu0 %v1221_v3  ;;  %v1235_v11 = vld [vmem:[#allocation2 + $0xa0] sm:$0xff]  ;;  %v1234_v14 = vld [vmem:[#allocation2 + $0x98] sm:$0xff]  ;;  %v1420_v17 = vld [vmem:[%s1655_s0 + $0x10] sm:$0xff]  ;;  %v100_v21 = vrot.slane %v1415_v16, 7  ;;  %v117_v24 = vrot.slane %v1415_v16, 1 }
  0x12   :  { %350 = vmatpush.bf16.msra.mxu1 %v1229_v4  ;;  %v1410_v15 = vld [vmem:[%s1655_s0] sm:$0xff]  ;;  %v1217_v18 = vld [vmem:[#allocation2 + $0x10] sm:$0xff]  ;;  %v119_v25 = vrot.slane %v1420_v17, 1  ;;  %v1216_v26 = vld [vmem:[#allocation2 + $0x8] sm:$0xff]  ;;  %v102_v48 = vrot.slane %v1420_v17, 7 }
  0x13   :  { %369 = vmatpush.bf16.msra.mxu2 %v1237_v5  ;;  %v1225_v19 = vld [vmem:[#allocation2 + $0x50] sm:$0xff]  ;;  %v99_v20 = vrot.slane %v1410_v15, 7  ;;  %v116_v23 = vrot.slane %v1410_v15, 1  ;;  %v1224_v27 = vld [vmem:[#allocation2 + $0x48] sm:$0xff]  ;;  %v1430_v28 = vld [vmem:[%s1656_s1] sm:$0xff]  ;;  %v133_v45 = vpack.c.bf16 %v1415_v16, %v1410_v15 }
  0x14   :  { %v1233_v22 = vld [vmem:[#allocation2 + $0x90] sm:$0xff]  ;;  %v1232_v32 = vld [vmem:[#allocation2 + $0x88] sm:$0xff]  ;;  %v1447_v34 = vld [vmem:[%s1656_s1 + $0x18] sm:$0xff]  ;;  %v120_v36 = vsel %vm115_vm1, %v117_v24, %v119_v25  ;;  %v103_v53 = vsel %vm98_vm0, %v100_v21, %v102_v48 }
  0x15   :  { %332 = vmatpush.bf16.msra.mxu0 %v1220_v6  ;;  %v1435_v29 = vld [vmem:[%s1656_s1 + $0x10] sm:$0xff]  ;;  %v101_v30 = vsel %vm98_vm0, %v99_v20, %v100_v21  ;;  %v110_v31 = vsel %vm98_vm0, 0.0, %v99_v20  ;;  %v1442_v33 = vld [vmem:[%s1656_s1 + $0x8] sm:$0xff]  ;;  %v118_v35 = vsel %vm115_vm1, %v116_v23, %v117_v24  ;;  %v1215_v39 = vld [vmem:[#allocation2] sm:$0xff]  ;;  %v129_v42 = vmul.f32 %v120_v36, %v1447_v34 }
  0x16   :  { %351 = vmatpush.bf16.msra.mxu1 %v1228_v7  ;;  %v111_v37 = vmul.f32 %v110_v31, %v1430_v28  ;;  %v112_v38 = vmul.f32 %v101_v30, %v1435_v29  ;;  %v1223_v40 = vld [vmem:[#allocation2 + $0x40] sm:$0xff]  ;;  %v128_v41 = vmul.f32 %v118_v35, %v1442_v33  ;;  %v1460_v47 = vld [vmem:[%s1655_s0 + $0x18] sm:$0xff]  ;;  %v1473_v52 = vld [vmem:[%s1656_s1 + $0x30] sm:$0xff] }
  0x17   :  { %370 = vmatpush.bf16.msra.mxu2 %v1236_v8  ;;  %v1231_v43 = vld [vmem:[#allocation2 + $0x80] sm:$0xff]  ;;  %v104_v49 = vrot.slane %v1460_v47, 7  ;;  %v121_v50 = vrot.slane %v1460_v47, 1  ;;  %v1480_v55 = vld [vmem:[%s1656_s1 + $0x28] sm:$0xff]  ;;  %v1485_v56 = vld [vmem:[%s1656_s1 + $0x38] sm:$0xff]  ;;  %v136_v0 = vpack.c.bf16 %v1460_v47, %v1420_v17 }
  0x18   :  { %v132_v44 = vpack.c.bf16 %v112_v38, %v111_v37  ;;  %v134_v46 = vpack.c.bf16 %v129_v42, %v128_v41  ;;  %v1468_v51 = vld [vmem:[%s1656_s1 + $0x20] sm:$0xff]  ;;  %v74_v2 = vld [vmem:[%s1659_s4 + $0x78] sm:$0xff]  ;;  %v73_v3 = vld [vmem:[%s1659_s4 + $0x70] sm:$0xff] }
  0x19   :  { %333 = vmatpush.bf16.msra.mxu0 %v1219_v9  ;;  %v105_v54 = vsel %vm98_vm0, %v102_v48, %v104_v49  ;;  %v122_v57 = vsel %vm115_vm1, %v119_v25, %v121_v50  ;;  %v127_v58 = vsel %vm115_vm1, %v121_v50, 0.0  ;;  %v113_v59 = vmul.f32 %v103_v53, %v1468_v51  ;;  %410 = vmatpush.msra.mxu3 %v74_v2  ;;  %v72_v4 = vld [vmem:[%s1659_s4 + $0x68] sm:$0xff]  ;;  %v71_v5 = vld [vmem:[%s1659_s4 + $0x60] sm:$0xff]  ;;  %v70_v6 = vld [vmem:[%s1659_s4 + $0x58] sm:$0xff] }
  0x1a   :  { %352 = vmatpush.bf16.msra.mxu1 %v1227_v10  ;;  %v114_v60 = vmul.f32 %v105_v54, %v1473_v52  ;;  %v130_v61 = vmul.f32 %v122_v57, %v1480_v55  ;;  %v131_v62 = vmul.f32 %v127_v58, %v1485_v56  ;;  %v69_v7 = vld [vmem:[%s1659_s4 + $0x50] sm:$0xff]  ;;  %v68_v8 = vld [vmem:[%s1659_s4 + $0x48] sm:$0xff] }
  0x1b   :  { %371 = vmatpush.bf16.msra.mxu2 %v1235_v11  ;;  %411 = vmatpush.msra.mxu3 %v73_v3  ;;  %v67_v11 = vld [vmem:[%s1659_s4 + $0x40] sm:$0xff]  ;;  %v61_v23 = vld [vmem:[%s1659_s4 + $0x10] sm:$0xff]  ;;  %v60_v24 = vld [vmem:[%s1659_s4 + $0x8] sm:$0xff] }
  0x1c   :  { %v135_v63 = vpack.c.bf16 %v114_v60, %v113_v59  ;;  %v137_v1 = vpack.c.bf16 %v131_v62, %v130_v61 }
  0x1d   :  { %334 = vmatpush.bf16.msra.mxu0 %v1218_v12  ;;  %412 = vmatpush.msra.mxu3 %v72_v4  ;;  %v66_v12 = vld [vmem:[%s1659_s4 + $0x38] sm:$0xff] }
  0x1e   :  { %353 = vmatpush.bf16.msra.mxu1 %v1226_v13  ;;  %v65_v13 = vld [vmem:[%s1659_s4 + $0x30] sm:$0xff] }
  0x1f   :  { %372 = vmatpush.bf16.msra.mxu2 %v1234_v14  ;;  %413 = vmatpush.msra.mxu3 %v71_v5  ;;  %v64_v14 = vld [vmem:[%s1659_s4 + $0x28] sm:$0xff] }
  0x21   :  { %335 = vmatpush.bf16.msra.mxu0 %v1217_v18  ;;  %414 = vmatpush.msra.mxu3 %v70_v6 }
  0x22   :  { %354 = vmatpush.bf16.msra.mxu1 %v1225_v19  ;;  %v63_v19 = vld [vmem:[%s1659_s4 + $0x20] sm:$0xff] }
  0x23   :  { %373 = vmatpush.bf16.msra.mxu2 %v1233_v22  ;;  %415 = vmatpush.msra.mxu3 %v69_v7  ;;  %v62_v22 = vld [vmem:[%s1659_s4 + $0x18] sm:$0xff] }
  0x25   :  { %336 = vmatpush.bf16.msra.mxu0 %v1216_v26  ;;  %416 = vmatpush.msra.mxu3 %v68_v8  ;;  %v59_v26 = vld [vmem:[%s1659_s4] sm:$0xff] }
  0x26   :  { %355 = vmatpush.bf16.msra.mxu1 %v1224_v27 }
  0x27   :  { %374 = vmatpush.bf16.msra.mxu2 %v1232_v32  ;;  %417 = vmatpush.msra.mxu3 %v67_v11 }
  0x29   :  { %337 = vmatpush.bf16.msra.mxu0 %v1215_v39  ;;  %418 = vmatpush.msra.mxu3 %v66_v12 }
  0x2a   :  { %356 = vmatpush.bf16.msra.mxu1 %v1223_v40 }
  0x2b   :  { %375 = vmatpush.bf16.msra.mxu2 %v1231_v43  ;;  %419 = vmatpush.msra.mxu3 %v65_v13 }
  0x2c   :  { %338 = vmatmul.bf16.vlgmr.msra.gmra.mxu0 %v132_v44 }
  0x2d   :  { %357 = vmatmul.bf16.vlgmr.msra.gmra.mxu1 %v133_v45  ;;  %518 = vmatpush.msrb.mxu0 %v74_v2 }
  0x2e   :  { %376 = vmatmul.bf16.vlgmr.msra.gmra.mxu2 %v134_v46  ;;  %420 = vmatpush.msra.mxu3 %v64_v14 }
  0x2f   :  { %519 = vmatpush.msrb.mxu0 %v73_v3 }
  0x30   :  { %421 = vmatpush.msra.mxu3 %v63_v19 }
  0x31   :  { %520 = vmatpush.msrb.mxu0 %v72_v4 }
  0x32   :  { %422 = vmatpush.msra.mxu3 %v62_v22 }
  0x33   :  { %521 = vmatpush.msrb.mxu0 %v71_v5 }
  0x34   :  { %423 = vmatpush.msra.mxu3 %v61_v23 }
  0x35   :  { %522 = vmatpush.msrb.mxu0 %v70_v6 }
  0x36   :  { %424 = vmatpush.msra.mxu3 %v60_v24 }
  0x37   :  { %523 = vmatpush.msrb.mxu0 %v69_v7 }
  0x38   :  { %425 = vmatpush.msra.mxu3 %v59_v26 }
  0x39   :  { %524 = vmatpush.msrb.mxu0 %v68_v8 }
  0x3b   :  { %525 = vmatpush.msrb.mxu0 %v67_v11 }
  0x3c   :  { %343 = vmatmul.bf16.gmra.mxu0 %v135_v63 }
  0x3d   :  { %362 = vmatmul.bf16.gmra.mxu1 %v136_v0  ;;  %526 = vmatpush.msrb.mxu0 %v66_v12 }
  0x3e   :  { %381 = vmatmul.bf16.gmra.mxu2 %v137_v1 }
  0x3f   :  { %527 = vmatpush.msrb.mxu0 %v65_v13 }
  0x41   :  { %528 = vmatpush.msrb.mxu0 %v64_v14 }
  0x43   :  { %529 = vmatpush.msrb.mxu0 %v63_v19 }
  0x45   :  { %530 = vmatpush.msrb.mxu0 %v62_v22 }
  0x47   :  { %531 = vmatpush.msrb.mxu0 %v61_v23 }
  0x49   :  { %532 = vmatpush.msrb.mxu0 %v60_v24 }
  0x4b   :  { %533 = vmatpush.msrb.mxu0 %v59_v26 }
  0x4d   :  { %912 = vmatpush.msra.mxu0 %v74_v2 }
  0x4f   :  { %913 = vmatpush.msra.mxu0 %v73_v3 }
  0x51   :  { %914 = vmatpush.msra.mxu0 %v72_v4 }
  0x53   :  { %915 = vmatpush.msra.mxu0 %v71_v5 }
  0x55   :  { %916 = vmatpush.msra.mxu0 %v70_v6 }
  0x57   :  { %917 = vmatpush.msra.mxu0 %v69_v7 }
  0x59   :  { %918 = vmatpush.msra.mxu0 %v68_v8 }
  0x5b   :  { %919 = vmatpush.msra.mxu0 %v67_v11 }
  0x5d   :  { %920 = vmatpush.msra.mxu0 %v66_v12 }
  0x5f   :  { %921 = vmatpush.msra.mxu0 %v65_v13  ;;  %v1567_v13 = vld [vmem:[%s1660_s5] sm:$0xff] }
  0x60   :  { %476 = vmatpush.msrb.mxu3 %v1567_v13 }
  0x61   :  { %922 = vmatpush.msra.mxu0 %v64_v14 }
  0x63   :  { %923 = vmatpush.msra.mxu0 %v63_v19 }
  0x65   :  { %924 = vmatpush.msra.mxu0 %v62_v22 }
  0x67   :  { %925 = vmatpush.msra.mxu0 %v61_v23 }
  0x69   :  { %926 = vmatpush.msra.mxu0 %v60_v24 }
  0x6b   :  { %927 = vmatpush.msra.mxu0 %v59_v26 }
  0xa9   :  { %v339_v9 = vpop.f32.mrf.mxu0 }
  0xaa   :  { %v358_v10 = vpop.f32.mrf.mxu1 }
  0xab   :  { %v359_v31 = vadd.f32 %v358_v10, %v339_v9 }
  0xb1   :  { %v377_v18 = vpop.f32.mrf.mxu2  ;;  %v341_v20 = vpop.f32.mrf.mxu0 }
  0xb2   :  { %v360_v21 = vpop.f32.mrf.mxu1  ;;  %v1545_v38 = vadd.f32 %v377_v18, %v359_v31  ;;  %v85_v31 = vld [vmem:[%s1661_s6 + $0x1] sm:$0x1] }
  0xb3   :  { %v361_v32 = vadd.f32 %v360_v21, %v341_v20 }
  0xb4   :  { %v396_v43 = vmul.f32 %v1545_v38, %v1545_v38 }
  0xb9   :  { %v379_v25 = vpop.f32.mrf.mxu2  ;;  %v344_v27 = vpop.f32.mrf.mxu0 }
  0xba   :  { %v363_v30 = vpop.f32.mrf.mxu1  ;;  %v1543_v37 = vadd.f32 %v379_v25, %v361_v32  ;;  %v84_v25 = vld [vmem:[%s1661_s6] sm:$0x1] }
  0xbb   :  { %v364_v35 = vadd.f32 %v363_v30, %v344_v27 }
  0xbc   :  { %v397_v42 = vmul.f32 %v1543_v37, %v1543_v37  ;;  %v387_v44 = vadd.f32 %v1543_v37, %v1545_v38 }
  0xbe   :  { %v400_v49 = vadd.f32 %v397_v42, %v396_v43 }
  0xc1   :  { %v382_v36 = vpop.f32.mrf.mxu2  ;;  %v346_v40 = vpop.f32.mrf.mxu0 }
  0xc2   :  { %v1547_v39 = vadd.f32 %v382_v36, %v364_v35  ;;  %v365_v41 = vpop.f32.mrf.mxu1 }
  0xc3   :  { %v366_v46 = vadd.f32 %v365_v41, %v346_v40 }
  0xc4   :  { %v398_v45 = vmul.f32 %v1547_v39, %v1547_v39  ;;  %v388_v50 = vadd.f32 %v387_v44, %v1547_v39 }
  0xc6   :  { %v401_v54 = vadd.f32 %v400_v49, %v398_v45 }
  0xc9   :  { %v384_v48 = vpop.f32.mrf.mxu2 }
  0xca   :  { %v1558_v53 = vadd.f32 %v384_v48, %v366_v46 }
  0xcc   :  { %v389_v57 = vadd.f32 %v388_v50, %v1558_v53  ;;  %v399_v58 = vmul.f32 %v1558_v53, %v1558_v53 }
  0xce   :  { %v390_v59 = vrot.slane %v389_v57, 4  ;;  %v402_v60 = vadd.f32 %v401_v54, %v399_v58 }
  0xd0   :  { %v391_v61 = vadd.f32 %v390_v59, %v389_v57  ;;  %v403_v62 = vrot.slane %v402_v60, 4 }
  0xd2   :  { %v392_v63 = vrot.slane %v391_v61, 2  ;;  %v404_v0 = vadd.f32 %v403_v62, %v402_v60 }
  0xd4   :  { %v393_v1 = vadd.f32 %v392_v63, %v391_v61  ;;  %v405_v2 = vrot.slane %v404_v0, 2 }
  0xd6   :  { %v394_v3 = vrot.slane %v393_v1, 1  ;;  %v406_v4 = vadd.f32 %v405_v2, %v404_v0 }
  0xd8   :  { %v407_v5 = vrot.slane %v406_v4, 1  ;;  %v395_v6 = vadd.f32 %v394_v3, %v393_v1 }
  0xda   :  { %v408_v7 = vadd.f32 %v407_v5, %v406_v4 }
  0xdc   :  { %v409_v8 = vsel %vm98_vm0, %v395_v6, %v408_v7 }
  0xdd   :  { %426 = vmatmul.f32.vlgmr.msra.gmra.mxu3 %v409_v8 }
  0xde   :  { %583 = vmatpush.msra.mxu3 %v1567_v13 }
 0x160   :  { %v427_v9 = vpop.f32.mrf.mxu3 }
 0x161   :  { %v430_v10 = vmul.f32 0.001953125, %v427_v9 }
 0x163   :  { %v431_v11 = vmul.f32 %v430_v10, %v430_v10 }
 0x165   :  { %v433_v12 = vrot.slane %v431_v11, 7 }
 0x167   :  { %v435_v14 = vsub.f32 %v430_v10, %v433_v12 }
 0x169   :  { %v436_v18 = vadd.f32 1e-05, %v435_v14 }
 0x16b   :  { %1270 = vrsqrt.f32 %v436_v18  ;;  %vm443_vm3 = vweird.f32 %v436_v18 }
 0x171   :  { %v1271_v19 = vpop.eup %1270 }
 0x172   :  { %v438_v20 = vmul.f32 %v1271_v19, %v436_v18  ;;  %vm444_vm2 = vweird.f32 %v1271_v19 }
 0x173   :  { %vm445_vm4 = vmor %vm443_vm3, %vm444_vm2 }
 0x174   :  { %v439_v21 = vmul.f32 %v1271_v19, %v438_v20 }
 0x176   :  { %v440_v22 = vmul.f32 0.5, %v439_v21 }
 0x178   :  { %v441_v23 = vsub.f32 1.5, %v440_v22 }
 0x17a   :  { %v442_v24 = vmul.f32 %v1271_v19, %v441_v23 }
 0x17c   :  { %v446_v26 = vsel %vm445_vm4, %v1271_v19, %v442_v24 }
 0x17d   :  { %v448_v27 = vrot.slane %v446_v26, 1  ;;  %v1254_v26 = vld [vmem:[#allocation5 + $0x78] sm:$0xff] }
 0x17e   :  { %851 = vmatpush.bf16.msrb.mxu2 %v1254_v26 }
 0x17f   :  { %v450_v30 = vmul.f32 %v448_v27, %v84_v25  ;;  %v1246_v27 = vld [vmem:[#allocation5 + $0x38] sm:$0xff] }
 0x180   :  { %832 = vmatpush.bf16.msrb.mxu1 %v1246_v27 }
 0x181   :  { %v451_v32 = vmul.f32 %v450_v30, %v430_v10 }
 0x183   :  { %v452_v35 = vsub.f32 %v85_v31, %v451_v32  ;;  %v1262_v31 = vld [vmem:[#allocation5 + $0xb8] sm:$0xff]  ;;  %v1253_v32 = vld [vmem:[#allocation5 + $0x70] sm:$0xff] }
 0x184   :  { %852 = vmatpush.bf16.msrb.mxu2 %v1253_v32 }
 0x185   :  { %v454_v36 = vrot.slane %v452_v35, 7  ;;  %v1245_v35 = vld [vmem:[#allocation5 + $0x30] sm:$0xff] }
 0x186   :  { %833 = vmatpush.bf16.msrb.mxu1 %v1245_v35 }
 0x187   :  { %v456_v40 = vsel %vm98_vm0, %v450_v30, %v454_v36  ;;  %v1261_v36 = vld [vmem:[#allocation5 + $0xb0] sm:$0xff] }
 0x188   :  { %1116 = vmatmul.msk.f32.vlgmr.msrb.gmra.mxu3 %vm457_vm5, %v456_v40  ;;  %v1252_v40 = vld [vmem:[#allocation5 + $0x68] sm:$0xff] }
 0x189   :  { %870 = vmatpush.bf16.msrb.mxu3 %v1262_v31  ;;  %853 = vmatpush.bf16.msrb.mxu2 %v1252_v40 }
 0x18d   :  { %871 = vmatpush.bf16.msrb.mxu3 %v1261_v36 }
 0x20b   :  { %v478_v41 = vpop.f32.mrf.mxu3 }
 0x20c   :  { %v481_v42 = vperm.slane %v478_v41, 0  ;;  %v486_v43 = vperm.slane %v478_v41, 1  ;;  %v1244_v41 = vld [vmem:[#allocation5 + $0x28] sm:$0xff] }
 0x20d   :  { %834 = vmatpush.bf16.msrb.mxu1 %v1244_v41 }
 0x20e   :  { %v482_v44 = vmul.f32 %v481_v42, %v1545_v38  ;;  %v483_v45 = vmul.f32 %v481_v42, %v1543_v37  ;;  %v484_v46 = vmul.f32 %v481_v42, %v1547_v39  ;;  %v485_v48 = vmul.f32 %v481_v42, %v1558_v53  ;;  %v1260_v42 = vld [vmem:[#allocation5 + $0xa8] sm:$0xff] }
 0x20f   :  { %872 = vmatpush.bf16.msrb.mxu3 %v1260_v42 }
 0x210   :  { %v487_v49 = vadd.f32 %v486_v43, %v482_v44  ;;  %v488_v50 = vadd.f32 %v486_v43, %v483_v45  ;;  %v489_v54 = vadd.f32 %v486_v43, %v484_v46  ;;  %v490_v57 = vadd.f32 %v486_v43, %v485_v48  ;;  %v1251_v45 = vld [vmem:[#allocation5 + $0x60] sm:$0xff] }
 0x211   :  { %v1243_v46 = vld [vmem:[#allocation5 + $0x20] sm:$0xff]  ;;  %854 = vmatpush.bf16.msrb.mxu2 %v1251_v45 }
 0x212   :  { %v1583_v58 = vmax.f32 %v487_v49, 0.0  ;;  %v1585_v59 = vmax.f32 %v488_v50, 0.0  ;;  %v1587_v60 = vmax.f32 %v489_v54, 0.0  ;;  %v1589_v61 = vmax.f32 %v490_v57, 0.0  ;;  %v1259_v48 = vld [vmem:[#allocation5 + $0xa0] sm:$0xff]  ;;  %v1250_v54 = vld [vmem:[#allocation5 + $0x58] sm:$0xff]  ;;  %835 = vmatpush.bf16.msrb.mxu1 %v1243_v46 }
 0x213   :  { %v1242_v57 = vld [vmem:[#allocation5 + $0x18] sm:$0xff]  ;;  %873 = vmatpush.bf16.msrb.mxu3 %v1259_v48 }
 0x214   :  { %v495_v38 = vadd.f32 %v1585_v59, %v1583_v58  ;;  %v504_v37 = vmul.f32 %v1583_v58, %v1583_v58  ;;  %v505_v39 = vmul.f32 %v1585_v59, %v1585_v59  ;;  %v506_v53 = vmul.f32 %v1587_v60, %v1587_v60 }
 0x215   :  { %v507_v1 = vmul.f32 %v1589_v61, %v1589_v61  ;;  %855 = vmatpush.bf16.msrb.mxu2 %v1250_v54 }
 0x216   :  { %v496_v62 = vadd.f32 %v495_v38, %v1587_v60  ;;  %v508_v63 = vadd.f32 %v505_v39, %v504_v37  ;;  %v1258_v38 = vld [vmem:[#allocation5 + $0x98] sm:$0xff]  ;;  %836 = vmatpush.bf16.msrb.mxu1 %v1242_v57 }
 0x217   :  { %874 = vmatpush.bf16.msrb.mxu3 %v1258_v38 }
 0x218   :  { %v497_v0 = vadd.f32 %v496_v62, %v1589_v61  ;;  %v509_v2 = vadd.f32 %v508_v63, %v506_v53  ;;  %v1249_v53 = vld [vmem:[#allocation5 + $0x50] sm:$0xff]  ;;  %v86_v62 = vld [vmem:[%s1661_s6 + $0x2] sm:$0x1] }
 0x219   :  { %856 = vmatpush.bf16.msrb.mxu2 %v1249_v53 }
 0x21a   :  { %v498_v3 = vrot.slane %v497_v0, 4  ;;  %v510_v4 = vadd.f32 %v509_v2, %v507_v1  ;;  %v87_v2 = vld [vmem:[%s1661_s6 + $0x3] sm:$0x1] }
 0x21c   :  { %v499_v5 = vadd.f32 %v498_v3, %v497_v0  ;;  %v511_v6 = vrot.slane %v510_v4, 4 }
 0x21e   :  { %v500_v7 = vrot.slane %v499_v5, 2  ;;  %v512_v8 = vadd.f32 %v511_v6, %v510_v4 }
 0x220   :  { %v501_v9 = vadd.f32 %v500_v7, %v499_v5  ;;  %v513_v10 = vrot.slane %v512_v8, 2  ;;  %v1248_v7 = vld [vmem:[#allocation5 + $0x48] sm:$0xff] }
 0x221   :  { %857 = vmatpush.bf16.msrb.mxu2 %v1248_v7 }
 0x222   :  { %v502_v11 = vrot.slane %v501_v9, 1  ;;  %v514_v12 = vadd.f32 %v513_v10, %v512_v8  ;;  %v1241_v8 = vld [vmem:[#allocation5 + $0x10] sm:$0xff]  ;;  %v1247_v10 = vld [vmem:[#allocation5 + $0x40] sm:$0xff] }
 0x223   :  { %837 = vmatpush.bf16.msrb.mxu1 %v1241_v8 }
 0x224   :  { %v515_v14 = vrot.slane %v514_v12, 1  ;;  %v503_v18 = vadd.f32 %v502_v11, %v501_v9  ;;  %v1257_v9 = vld [vmem:[#allocation5 + $0x90] sm:$0xff]  ;;  %v1240_v11 = vld [vmem:[#allocation5 + $0x8] sm:$0xff] }
 0x225   :  { %875 = vmatpush.bf16.msrb.mxu3 %v1257_v9  ;;  %858 = vmatpush.bf16.msrb.mxu2 %v1247_v10 }
 0x226   :  { %v516_v19 = vadd.f32 %v515_v14, %v514_v12  ;;  %v1256_v12 = vld [vmem:[#allocation5 + $0x88] sm:$0xff]  ;;  %v1239_v14 = vld [vmem:[#allocation5] sm:$0xff] }
 0x227   :  { %838 = vmatpush.bf16.msrb.mxu1 %v1240_v11 }
 0x228   :  { %v517_v20 = vsel %vm98_vm0, %v503_v18, %v516_v19  ;;  %v1255_v18 = vld [vmem:[#allocation5 + $0x80] sm:$0xff] }
 0x229   :  { %534 = vmatmul.f32.vlgmr.msrb.gmra.mxu0 %v517_v20  ;;  %876 = vmatpush.bf16.msrb.mxu3 %v1256_v12 }
 0x22b   :  { %839 = vmatpush.bf16.msrb.mxu1 %v1239_v14 }
 0x22d   :  { %877 = vmatpush.bf16.msrb.mxu3 %v1255_v18 }
 0x22f   :  { %977 = vmatpush.msra.mxu1 %v1567_v13 }
 0x2a6   :  { %v535_v21 = vpop.f32.mrf.mxu0 }
 0x2a7   :  { %v538_v22 = vmul.f32 0.001953125, %v535_v21 }
 0x2a9   :  { %v539_v23 = vmul.f32 %v538_v22, %v538_v22 }
 0x2ab   :  { %v541_v24 = vrot.slane %v539_v23, 7 }
 0x2ad   :  { %v543_v25 = vsub.f32 %v538_v22, %v541_v24 }
 0x2af   :  { %v544_v30 = vadd.f32 1e-05, %v543_v25 }
 0x2b1   :  { %1272 = vrsqrt.f32 %v544_v30  ;;  %vm551_vm7 = vweird.f32 %v544_v30 }
 0x2b7   :  { %v1273_v43 = vpop.eup %1272 }
 0x2b8   :  { %v546_v44 = vmul.f32 %v1273_v43, %v544_v30  ;;  %vm552_vm6 = vweird.f32 %v1273_v43 }
 0x2b9   :  { %vm553_vm8 = vmor %vm551_vm7, %vm552_vm6 }
 0x2ba   :  { %v547_v49 = vmul.f32 %v1273_v43, %v546_v44 }
 0x2bc   :  { %v548_v50 = vmul.f32 0.5, %v547_v49 }
 0x2be   :  { %v549_v37 = vsub.f32 1.5, %v548_v50 }
 0x2c0   :  { %v550_v39 = vmul.f32 %v1273_v43, %v549_v37 }
 0x2c2   :  { %v554_v63 = vsel %vm553_vm8, %v1273_v43, %v550_v39 }
 0x2c3   :  { %v556_v0 = vrot.slane %v554_v63, 1 }
 0x2c5   :  { %v558_v1 = vmul.f32 %v556_v0, %v86_v62 }
 0x2c7   :  { %v559_v3 = vmul.f32 %v558_v1, %v538_v22 }
 0x2c9   :  { %v560_v4 = vsub.f32 %v87_v2, %v559_v3 }
 0x2cb   :  { %v562_v5 = vrot.slane %v560_v4, 7 }
 0x2cd   :  { %v564_v6 = vsel %vm98_vm0, %v558_v1, %v562_v5 }
 0x2ce   :  { %1117 = vmatmul.msk.f32.vlgmr.msra.gmra.mxu3 %vm457_vm5, %v564_v6 }
 0x351   :  { %v585_v19 = vpop.f32.mrf.mxu3 }
 0x352   :  { %v588_v20 = vperm.slane %v585_v19, 0  ;;  %v593_v24 = vperm.slane %v585_v19, 1 }
 0x354   :  { %v589_v21 = vmul.f32 %v588_v20, %v1583_v58  ;;  %v590_v22 = vmul.f32 %v588_v20, %v1585_v59  ;;  %v591_v23 = vmul.f32 %v588_v20, %v1587_v60  ;;  %v592_v58 = vmul.f32 %v588_v20, %v1589_v61 }
 0x356   :  { %v596_v25 = vadd.f32 %v593_v24, %v591_v23  ;;  %v594_v26 = vadd.f32 %v593_v24, %v589_v21  ;;  %v595_v27 = vadd.f32 %v593_v24, %v590_v22  ;;  %v597_v49 = vadd.f32 %v593_v24, %v592_v58 }
 0x358   :  { %v621_v30 = vrot.slane %v596_v25, 1  ;;  %v618_v31 = vrot.slane %v594_v26, 1  ;;  %v619_v32 = vrot.slane %v595_v27, 1  ;;  %v635_v35 = vpack.c.bf16 %v595_v27, %v594_v26 }
 0x359   :  { %v602_v36 = vrot.slane %v594_v26, 7  ;;  %v603_v40 = vrot.slane %v595_v27, 7  ;;  %v623_v50 = vrot.slane %v597_v49, 1  ;;  %v605_v54 = vrot.slane %v596_v25, 7 }
 0x35a   :  { %859 = vmatmul.bf16.vlgmr.msrb.gmra.mxu2 %v635_v35  ;;  %v620_v13 = vsel %vm115_vm1, %v618_v31, %v619_v32  ;;  %v622_v41 = vsel %vm115_vm1, %v619_v32, %v621_v30  ;;  %v607_v61 = vrot.slane %v597_v49, 7  ;;  %v638_v37 = vpack.c.bf16 %v597_v49, %v596_v25 }
 0x35b   :  { %v604_v59 = vsel %vm98_vm0, %v602_v36, %v603_v40  ;;  %v613_v60 = vsel %vm98_vm0, 0.0, %v602_v36  ;;  %v630_v42 = vmul.f32 %v620_v13, %v1442_v33  ;;  %v631_v43 = vmul.f32 %v622_v41, %v1447_v34 }
 0x35c   :  { %v614_v44 = vmul.f32 %v613_v60, %v1430_v28  ;;  %v615_v45 = vmul.f32 %v604_v59, %v1435_v29  ;;  %v624_v57 = vsel %vm115_vm1, %v621_v30, %v623_v50  ;;  %v629_v38 = vsel %vm115_vm1, %v623_v50, 0.0 }
 0x35d   :  { %v636_v46 = vpack.c.bf16 %v631_v43, %v630_v42  ;;  %v606_v33 = vsel %vm98_vm0, %v603_v40, %v605_v54  ;;  %v608_v34 = vsel %vm98_vm0, %v605_v54, %v607_v61  ;;  %v632_v28 = vmul.f32 %v624_v57, %v1480_v55 }
 0x35e   :  { %v634_v48 = vpack.c.bf16 %v615_v45, %v614_v44  ;;  %v633_v29 = vmul.f32 %v629_v38, %v1485_v56  ;;  %v616_v39 = vmul.f32 %v606_v33, %v1468_v51  ;;  %v617_v53 = vmul.f32 %v608_v34, %v1473_v52 }
 0x35f   :  { %878 = vmatmul.bf16.vlgmr.msrb.gmra.mxu3 %v636_v46 }
 0x360   :  { %840 = vmatmul.bf16.vlgmr.msrb.gmra.mxu1 %v634_v48  ;;  %v639_v62 = vpack.c.bf16 %v633_v29, %v632_v28  ;;  %v637_v63 = vpack.c.bf16 %v617_v53, %v616_v39  ;;  %v88_v29 = vld [vmem:[%s1661_s6 + $0x4] sm:$0x1] }
 0x36a   :  { %864 = vmatmul.bf16.gmra.mxu2 %v638_v37 }
 0x36f   :  { %883 = vmatmul.bf16.gmra.mxu3 %v639_v62 }
 0x370   :  { %845 = vmatmul.bf16.gmra.mxu1 %v637_v63  ;;  %v89_v63 = vld [vmem:[%s1661_s6 + $0x5] sm:$0x1]  ;;  %s1358_s6 = smov [#allocation7]  }
 0x371   :  { %s1004_s25 = sshll.u32 %s1358_s6, 4  ;;  %s1005_s25 = int_to_ptr.vmem [resolvable:$true] %s1004_s25 }
 0x3dd   :  { %v841_v0 = vpop.f32.mrf.mxu1  ;;  %v860_v1 = vpop.f32.mrf.mxu2 }
 0x3de   :  { %v861_v56 = vadd.f32 %v860_v1, %v841_v0 }
 0x3e2   :  { %v879_v2 = vpop.f32.mrf.mxu3 }
 0x3e3   :  { %v880_v10 = vadd.f32 %v879_v2, %v861_v56 }
 0x3e5   :  { %v843_v3 = vpop.f32.mrf.mxu1  ;;  %v862_v4 = vpop.f32.mrf.mxu2  ;;  %v898_v18 = vmul.f32 %v880_v10, %v880_v10 }
 0x3e6   :  { %v863_v55 = vadd.f32 %v862_v4, %v843_v3 }
 0x3ea   :  { %v881_v5 = vpop.f32.mrf.mxu3 }
 0x3eb   :  { %v1633_v9 = vadd.f32 %v881_v5, %v863_v55 }
 0x3ed   :  { %v846_v6 = vpop.f32.mrf.mxu1  ;;  %v865_v7 = vpop.f32.mrf.mxu2  ;;  %v899_v14 = vmul.f32 %v1633_v9, %v1633_v9  ;;  %v889_v19 = vadd.f32 %v1633_v9, %v880_v10 }
 0x3ee   :  { %v866_v51 = vadd.f32 %v865_v7, %v846_v6 }
 0x3ef   :  { %v902_v23 = vadd.f32 %v899_v14, %v898_v18 }
 0x3f2   :  { %v884_v8 = vpop.f32.mrf.mxu3 }
 0x3f3   :  { %v885_v52 = vadd.f32 %v884_v8, %v866_v51 }
 0x3f5   :  { %v848_v11 = vpop.f32.mrf.mxu1  ;;  %v867_v12 = vpop.f32.mrf.mxu2  ;;  %v900_v20 = vmul.f32 %v885_v52, %v885_v52  ;;  %v890_v24 = vadd.f32 %v889_v19, %v885_v52 }
 0x3f6   :  { %v868_v21 = vadd.f32 %v867_v12, %v848_v11 }
 0x3f7   :  { %v903_v26 = vadd.f32 %v902_v23, %v900_v20 }
 0x3fa   :  { %v886_v22 = vpop.f32.mrf.mxu3 }
 0x3fb   :  { %v887_v25 = vadd.f32 %v886_v22, %v868_v21 }
 0x3fd   :  { %v891_v27 = vadd.f32 %v890_v24, %v887_v25  ;;  %v901_v30 = vmul.f32 %v887_v25, %v887_v25 }
 0x3ff   :  { %v892_v31 = vrot.slane %v891_v27, 4  ;;  %v904_v32 = vadd.f32 %v903_v26, %v901_v30 }
 0x401   :  { %v893_v35 = vadd.f32 %v892_v31, %v891_v27  ;;  %v905_v36 = vrot.slane %v904_v32, 4 }
 0x403   :  { %v894_v40 = vrot.slane %v893_v35, 2  ;;  %v906_v13 = vadd.f32 %v905_v36, %v904_v32 }
 0x405   :  { %v895_v41 = vadd.f32 %v894_v40, %v893_v35  ;;  %v907_v58 = vrot.slane %v906_v13, 2 }
 0x407   :  { %v896_v59 = vrot.slane %v895_v41, 1  ;;  %v908_v60 = vadd.f32 %v907_v58, %v906_v13 }
 0x409   :  { %v909_v42 = vrot.slane %v908_v60, 1  ;;  %v897_v43 = vadd.f32 %v896_v59, %v895_v41 }
 0x40b   :  { %v910_v44 = vadd.f32 %v909_v42, %v908_v60 }
 0x40d   :  { %v911_v45 = vsel %vm98_vm0, %v897_v43, %v910_v44 }
 0x40e   :  { %928 = vmatmul.f32.vlgmr.msra.gmra.mxu0 %v911_v45 }
 0x48b   :  { %v929_v46 = vpop.f32.mrf.mxu0 }
 0x48c   :  { %v932_v48 = vmul.f32 0.001953125, %v929_v46 }
 0x48e   :  { %v933_v49 = vmul.f32 %v932_v48, %v932_v48 }
 0x490   :  { %v935_v50 = vrot.slane %v933_v49, 7 }
 0x492   :  { %v937_v54 = vsub.f32 %v932_v48, %v935_v50 }
 0x494   :  { %v938_v61 = vadd.f32 1e-05, %v937_v54 }
 0x496   :  { %1274 = vrsqrt.f32 %v938_v61  ;;  %vm945_vm10 = vweird.f32 %v938_v61 }
 0x49c   :  { %v1275_v57 = vpop.eup %1274 }
 0x49d   :  { %v940_v38 = vmul.f32 %v1275_v57, %v938_v61  ;;  %vm946_vm9 = vweird.f32 %v1275_v57 }
 0x49e   :  { %vm947_vm11 = vmor %vm945_vm10, %vm946_vm9 }
 0x49f   :  { %v941_v33 = vmul.f32 %v1275_v57, %v940_v38 }
 0x4a1   :  { %v942_v34 = vmul.f32 0.5, %v941_v33 }
 0x4a3   :  { %v943_v37 = vsub.f32 1.5, %v942_v34 }
 0x4a5   :  { %v944_v28 = vmul.f32 %v1275_v57, %v943_v37 }
 0x4a7   :  { %v948_v39 = vsel %vm947_vm11, %v1275_v57, %v944_v28 }
 0x4a8   :  { %v950_v53 = vrot.slane %v948_v39, 1 }
 0x4aa   :  { %v952_v62 = vmul.f32 %v950_v53, %v88_v29 }
 0x4ac   :  { %v953_v0 = vmul.f32 %v952_v62, %v932_v48 }
 0x4ae   :  { %v954_v1 = vsub.f32 %v89_v63, %v953_v0 }
 0x4b0   :  { %v956_v2 = vrot.slane %v954_v1, 7 }
 0x4b2   :  { %v958_v3 = vsel %vm98_vm0, %v952_v62, %v956_v2 }
 0x4b3   :  { %1214 = vmatmul.msk.f32.vlgmr.msra.gmra.mxu1 %vm457_vm5, %v958_v3 }
 0x530   :  { %v979_v4 = vpop.f32.mrf.mxu1 }
 0x531   :  { %v982_v5 = vperm.slane %v979_v4, 0  ;;  %v987_v6 = vperm.slane %v979_v4, 1 }
 0x533   :  { %v983_v7 = vmul.f32 %v982_v5, %v880_v10  ;;  %v984_v55 = vmul.f32 %v982_v5, %v1633_v9  ;;  %v985_v8 = vmul.f32 %v982_v5, %v885_v52  ;;  %v986_v56 = vmul.f32 %v982_v5, %v887_v25 }
 0x535   :  { %v988_v51 = vadd.f32 %v987_v6, %v983_v7  ;;  %v989_v11 = vadd.f32 %v987_v6, %v984_v55  ;;  %v990_v12 = vadd.f32 %v987_v6, %v985_v8  ;;  %v991_v14 = vadd.f32 %v987_v6, %v986_v56 }
 0x537   :  { %v992_v18 = vadd.f32 %v988_v51, %v1410_v15  ;;  %v993_v19 = vadd.f32 %v989_v11, %v1415_v16  ;;  %v994_v10 = vadd.f32 %v990_v12, %v1420_v17  ;;  %v995_v9 = vadd.f32 %v991_v14, %v1460_v47 }
 0x539   :  { %996 = vst [vmem:[#allocation7] sm:$0xff] %v992_v18 }
 0x53a   :  { %997 = vst [vmem:[#allocation7 + $0x8] sm:$0xff] %v993_v19 }
 0x53b   :  { %998 = vst [vmem:[#allocation7 + $0x10] sm:$0xff] %v994_v10 }
 0x53c   :  { %999 = vst [vmem:[#allocation7 + $0x18] sm:$0xff] %v995_v9 }
 0x53d   :  { %1012 = dma.vmem_to_hbm [thread:$0]  %s1005_s25, 512, %s1007_s28, [#allocation4], %s1359_s29, %s1359_s29, %s1360_s30  }
 0x53e   :  { %1352 = dma.done.wait [#allocation4], 512  }
 0x53f   :  { %1353 = vsyncadd [#allocation4], 4294966784 }
 0x540   :  { %1017 = vsyncpa [#allocation3], 1 }
 0x541   :  { %1018 = vsyncpa [#allocation6], 1 }
 0x542   :  { %1019 = vsyncpa [#allocation4], 1 }

</bundles_post_ra>
